<compile_context>
chip_gen: v7x
topology: tpu7x:2x2x1
jax: 0.10.0
libtpu: 0.0.40
codegen_flags: <defaults>
</compile_context>

<pallas_src>
import functools

import jax
import jax.numpy as jnp
from jax import lax
from jax.experimental import pallas as pl
from jax.experimental.pallas import tpu as pltpu


def _round_up(x, m):
    return (x + m - 1) // m * m


def _vmem_limit_bytes():
    """Per-generation scoped-VMEM cap: 64 MiB on 128-MiB parts, 32 MiB on v7x."""
    try:
        cap = int(pltpu.get_tpu_info().vmem_capacity_bytes)
    except Exception:
        return 32 * 1024 * 1024
    return int(min(64 * 1024 * 1024, cap // 2))


def _pick_tm(m, k, cout, budget_bytes):
    """Largest M-tile (multiple of 8) whose double-buffered working set fits the budget."""
    bytes_per_row = 2 * (2 * k + 4 * cout) + 16   # dbl-buffered bf16 cols + <=f32 out
    tm = int(budget_bytes // max(bytes_per_row, 1))
    tm = max(256, min(tm, 8192))
    if tm >= m:
        return _round_up(m, 8)                    # whole layer in a single grid step
    return (tm // 256) * 256


# ----------------------------- kernels ---------------------------------------


def _conv_act_kernel(cols_ref, w_ref, b_ref, o_ref, *, use_act, slope):
    """Non-BN layer: conv-as-matmul (bf16 x bf16 -> f32 acc) + bias (+ LeakyReLU)."""
    acc = jnp.dot(cols_ref[...], w_ref[...], preferred_element_type=jnp.float32)
    acc = acc + b_ref[...]
    if use_act:
        acc = jnp.where(acc > 0, acc, slope * acc)
    o_ref[...] = acc.astype(o_ref.dtype)


def _conv_bn_act_kernel(cols_ref, w_ref, gamma_ref, beta_ref, o_ref,
                        *, m_true, eps, slope, use_act):
    """Single-grid-step BN layer: matmul + batch-stat BatchNorm + LeakyReLU, one pass.

    The conv bias cancels exactly under training-mode BatchNorm, so it is omitted.
    Zero-padded cols rows produce exactly-zero matmul rows -> they contribute
    nothing to the sums, so no row masking is needed (divide by the true count).
    """
    mm = jnp.dot(cols_ref[...], w_ref[...], preferred_element_type=jnp.float32)
    inv_m = 1.0 / m_true
    mu = jnp.sum(mm, axis=0, keepdims=True) * inv_m
    msq = jnp.sum(mm * mm, axis=0, keepdims=True) * inv_m
    var = jnp.maximum(msq - mu * mu, 0.0)
    scale = gamma_ref[...] * lax.rsqrt(var + eps)
    y = (mm - mu) * scale + beta_ref[...]
    if use_act:
        y = jnp.where(y > 0, y, slope * y)
    o_ref[...] = y.astype(o_ref.dtype)


def _conv_stats_kernel(cols_ref, w_ref, y_ref, stats_ref):
    """BN pass 1 (multi-tile M): matmul -> bf16 y plus per-tile partial sum / sumsq.

    Per-tile partials keep the M grid axis fully "parallel" (2-TC sharding on v7x)
    and avoid a resident cross-tile accumulator and per-step row masking.
    """
    mm = jnp.dot(cols_ref[...], w_ref[...], preferred_element_type=jnp.float32)
    y_ref[...] = mm.astype(y_ref.dtype)
    stats_ref[0:1, :] = jnp.sum(mm, axis=0, keepdims=True)
    stats_ref[1:2, :] = jnp.sum(mm * mm, axis=0, keepdims=True)


def _scale_act_kernel(y_ref, scale_ref, shift_ref, o_ref, *, use_act, slope):
    """BN pass 2 (multi-tile M): y * scale + shift (+ LeakyReLU), written in place."""
    y = y_ref[...].astype(jnp.float32) * scale_ref[...] + shift_ref[...]
    if use_act:
        y = jnp.where(y > 0, y, slope * y)
    o_ref[...] = y.astype(o_ref.dtype)
    # TODO(synk): running_mean/running_var buffer updates are a training-side effect
    # and do not affect the forward output; not reproduced here.


# ----------------------------- host-side layer --------------------------------


def _im2col(xp, ksize, stride, ho, wo):
    """Host-side (XLA) im2col: gather the ksize x ksize strided taps of a padded NHWC input."""
    n, _, _, cin = xp.shape
    taps = []
    for kh in range(ksize):
        for kw in range(ksize):
            taps.append(lax.slice(
                xp,
                (0, kh, kw, 0),
                (n, kh + stride * (ho - 1) + 1, kw + stride * (wo - 1) + 1, cin),
                (1, stride, stride, 1)))                  # (N, Ho, Wo, Cin)
    cols = jnp.stack(taps, axis=3)                        # (N, Ho, Wo, Kh*Kw, Cin)
    return cols.reshape(n * ho * wo, ksize * ksize * cin)


def conv_block(x_nhwc, w_oihw, b, gamma, beta, *, stride=2, pad=1,
               use_bn, use_act, eps=1e-5, slope=0.2, out_dtype=jnp.bfloat16):
    n, h, w, cin = x_nhwc.shape
    cout, _, kh, kw = w_oihw.shape
    ho = (h + 2 * pad - kh) // stride + 1
    wo = (w + 2 * pad - kw) // stride + 1
    m = n * ho * wo
    k = kh * kw * cin

    # TODO(synk): fuse im2col into the kernel (manual DMA of the overlapping 4x4
    # input windows) to avoid materializing cols in HBM; kept host-side but built
    # directly in bf16 with no K padding.
    xp = jnp.pad(x_nhwc.astype(jnp.bfloat16), ((0, 0), (pad, pad), (pad, pad), (0, 0)))
    cols = _im2col(xp, kh, stride, ho, wo)                # (M, K) bf16

    vmem_limit = _vmem_limit_bytes()
    tm = _pick_tm(m, k, cout, vmem_limit // 3)
    m_pad = _round_up(m, tm)
    if m_pad > m:
        cols = jnp.pad(cols, ((0, m_pad - m), (0, 0)))
    num_tiles = m_pad // tm
    grid = (num_tiles,)

    # (Cout, Cin, Kh, Kw) -> (Kh, Kw, Cin, Cout) -> (K, Cout), matching tap order.
    w2d = jnp.transpose(w_oihw, (2, 3, 1, 0)).reshape(k, cout).astype(jnp.bfloat16)
    b_row = b.reshape(1, cout).astype(jnp.float32)
    gamma_row = gamma.reshape(1, cout).astype(jnp.float32)
    beta_row = beta.reshape(1, cout).astype(jnp.float32)

    cols_spec = pl.BlockSpec((tm, k), lambda i: (i, 0))       # K = full dim (no pad)
    w_spec = pl.BlockSpec((k, cout), lambda i: (0, 0))
    vec_spec = pl.BlockSpec((1, cout), lambda i: (0, 0))
    out_spec = pl.BlockSpec((tm, cout), lambda i: (i, 0))     # Cout = full dim (no pad)

    params = pltpu.CompilerParams(dimension_semantics=("parallel",),
                                  vmem_limit_bytes=vmem_limit)
    out_bytes = jnp.dtype(out_dtype).itemsize

    if not use_bn:
        cost = pl.CostEstimate(
            flops=2 * m_pad * k * cout, transcendentals=0,
            bytes_accessed=m_pad * k * 2 + k * cout * 2 + cout * 4
            + m_pad * cout * out_bytes)
        out2d = pl.pallas_call(
            functools.partial(_conv_act_kernel, use_act=use_act, slope=slope),
            out_shape=jax.ShapeDtypeStruct((m_pad, cout), out_dtype),
            grid=grid,
            in_specs=[cols_spec, w_spec, vec_spec],
            out_specs=out_spec,
            compiler_params=params,
            cost_estimate=cost,
        )(cols, w2d, b_row)
    elif num_tiles == 1:
        # Whole layer fits one grid step: conv + BN(batch stats) + act in ONE pass.
        cost = pl.CostEstimate(
            flops=2 * m_pad * k * cout + 6 * m_pad * cout, transcendentals=cout,
            bytes_accessed=m_pad * k * 2 + k * cout * 2 + 2 * cout * 4
            + m_pad * cout * out_bytes)
        out2d = pl.pallas_call(
            functools.partial(_conv_bn_act_kernel, m_true=float(m), eps=eps,
                              slope=slope, use_act=use_act),
            out_shape=jax.ShapeDtypeStruct((m_pad, cout), out_dtype),
            grid=grid,
            in_specs=[cols_spec, w_spec, vec_spec, vec_spec],
            out_specs=out_spec,
            compiler_params=params,
            cost_estimate=cost,
        )(cols, w2d, gamma_row, beta_row)
    else:
        # Pass 1: matmul -> bf16 y + tiny per-tile partial stats ("parallel" over M).
        stats_spec = pl.BlockSpec((None, 2, cout), lambda i: (i, 0, 0))
        cost1 = pl.CostEstimate(
            flops=2 * m_pad * k * cout, transcendentals=0,
            bytes_accessed=m_pad * k * 2 + k * cout * 2
            + m_pad * cout * 2 + num_tiles * 2 * cout * 4)
        y2d, part = pl.pallas_call(
            _conv_stats_kernel,
            out_shape=(jax.ShapeDtypeStruct((m_pad, cout), jnp.bfloat16),
                       jax.ShapeDtypeStruct((num_tiles, 2, cout), jnp.float32)),
            grid=grid,
            in_specs=[cols_spec, w_spec],
            out_specs=(pl.BlockSpec((tm, cout), lambda i: (i, 0)), stats_spec),
            compiler_params=params,
            cost_estimate=cost1,
        )(cols, w2d)
        # Combine the tiny partials and fold BN into per-channel scale/shift on host
        # (padded rows contributed exactly zero, so divide by the true M).
        tot = jnp.sum(part, axis=0)                       # (2, Cout) f32
        mu = tot[0] / m
        var = jnp.maximum(tot[1] / m - mu * mu, 0.0)
        scale = gamma_row * lax.rsqrt(var + eps)          # (1, Cout)
        shift = beta_row - mu.reshape(1, cout) * scale    # (1, Cout)
        # Pass 2: cheap VPU normalize + LeakyReLU, aliased in place over y.
        aliases = {0: 0} if out_dtype == jnp.bfloat16 else {}
        cost2 = pl.CostEstimate(
            flops=3 * m_pad * cout, transcendentals=0,
            bytes_accessed=m_pad * cout * (2 + out_bytes) + 2 * cout * 4)
        out2d = pl.pallas_call(
            functools.partial(_scale_act_kernel, use_act=use_act, slope=slope),
            out_shape=jax.ShapeDtypeStruct((m_pad, cout), out_dtype),
            grid=grid,
            in_specs=[pl.BlockSpec((tm, cout), lambda i: (i, 0)), vec_spec, vec_spec],
            out_specs=pl.BlockSpec((tm, cout), lambda i: (i, 0)),
            input_output_aliases=aliases,
            compiler_params=params,
            cost_estimate=cost2,
        )(y2d, scale, shift)

    if m_pad > m:
        out2d = out2d[:m]
    return out2d.reshape(n, ho, wo, cout)


# ----------------------------- full module ------------------------------------


def init_discriminator_params(key, params):
    """Deterministic synthetic parameters with the same shapes as the PyTorch module."""
    nc, nf = params['n_channels'], params['D_filters']
    chans = [(nc, nf), (nf, 2 * nf), (2 * nf, 4 * nf), (4 * nf, 1)]
    weights = {}
    for idx, (cin, cout) in enumerate(chans):
        key, kw, kb, kg, kbe = jax.random.split(key, 5)
        weights[f'w{idx}'] = 0.02 * jax.random.normal(kw, (cout, cin, 4, 4), jnp.float32)
        weights[f'b{idx}'] = 0.01 * jax.random.normal(kb, (cout,), jnp.float32)
        weights[f'gamma{idx}'] = 1.0 + 0.1 * jax.random.normal(kg, (cout,), jnp.float32)
        weights[f'beta{idx}'] = 0.1 * jax.random.normal(kbe, (cout,), jnp.float32)
    return weights


def discriminator_forward(weights, x_nchw):
    # Input is NCHW like the PyTorch module; compute internally in NHWC (bf16
    # activations between layers, f32 final output).
    x = jnp.transpose(x_nchw, (0, 2, 3, 1))
    layer_cfg = [(False, True), (True, True), (True, True), (False, False)]
    for idx, (use_bn, use_act) in enumerate(layer_cfg):
        last = idx == len(layer_cfg) - 1
        x = conv_block(x, weights[f'w{idx}'], weights[f'b{idx}'],
                       weights[f'gamma{idx}'], weights[f'beta{idx}'],
                       use_bn=use_bn, use_act=use_act,
                       out_dtype=jnp.float32 if last else jnp.bfloat16)
    # Back to NCHW: (N, 1, H/16, W/16)
    return jnp.transpose(x, (0, 3, 1, 2))


if __name__ == "__main__":
    params = {'n_channels': 3, 'D_filters': 8}

    key = jax.random.PRNGKey(0)
    key_w, key_x = jax.random.split(key)
    weights = init_discriminator_params(key_w, params)

    # Small NCHW input consistent with the module: (batch=2, channels=3, 16, 16).
    x = jax.random.normal(key_x, (2, params['n_channels'], 16, 16), jnp.float32)

    fwd = jax.jit(discriminator_forward)
    out = fwd(weights, x)
    jax.block_until_ready(out)

    assert out.shape == (2, 1, 1, 1), out.shape
    assert bool(jnp.all(jnp.isfinite(out)))
    print("KERNEL_OK")
</pallas_src>

<mosaic_0001>
module attributes {stable_mosaic.version = 11 : i64} {
  func.func @_conv_act_kernel(%arg0: i32, %arg1: memref<128x48xbf16, #tpu.memory_space<vmem>>, %arg2: memref<48x8xbf16, #tpu.memory_space<vmem>>, %arg3: memref<1x8xf32, #tpu.memory_space<vmem>>, %arg4: memref<128x8xbf16, #tpu.memory_space<vmem>>) attributes {dimension_semantics = [#tpu.dimension_semantics<parallel>], iteration_bounds = array<i64: 1>, scalar_prefetch = 0 : i64, scratch_operands = 0 : i64, tpu.core_type = #tpu.core_type<tc>, window_params = [{transform_indices = @transform_0, window_bounds = array<i64: 128, 48>}, {pipeline_mode = #tpu.pipeline_mode<synchronous>, transform_indices = @transform_1, window_bounds = array<i64: 48, 8>}, {pipeline_mode = #tpu.pipeline_mode<synchronous>, transform_indices = @transform_2, window_bounds = array<i64: 1, 8>}, {transform_indices = @transform_3, window_bounds = array<i64: 128, 8>}]} {
    %c0 = arith.constant 0 : index
    %c0_0 = arith.constant 0 : index
    %0 = vector.load %arg1[%c0, %c0_0] : memref<128x48xbf16, #tpu.memory_space<vmem>>, vector<128x48xbf16>
    %c0_1 = arith.constant 0 : index
    %c0_2 = arith.constant 0 : index
    %1 = vector.load %arg2[%c0_1, %c0_2] : memref<48x8xbf16, #tpu.memory_space<vmem>>, vector<48x8xbf16>
    %cst = arith.constant dense<0.000000e+00> : vector<128x8xf32>
    %2 = tpu.matmul %0, %1, %cst {dimension_numbers = #tpu.dot_dimension_numbers<[1], [0], [0], [1], [0, 0, 1, 1], [], []>} : vector<128x48xbf16>, vector<48x8xbf16>, vector<128x8xf32> -> vector<128x8xf32>
    %c0_3 = arith.constant 0 : index
    %c0_4 = arith.constant 0 : index
    %3 = vector.load %arg3[%c0_3, %c0_4] : memref<1x8xf32, #tpu.memory_space<vmem>>, vector<1x8xf32>
    %4 = vector.broadcast %3 : vector<1x8xf32> to vector<128x8xf32>
    %5 = arith.addf %2, %4 : vector<128x8xf32>
    %cst_5 = arith.constant 0.000000e+00 : f32
    %6 = vector.broadcast %cst_5 : f32 to vector<128x8xf32>
    %7 = arith.cmpf ogt, %5, %6 : vector<128x8xf32>
    %cst_6 = arith.constant 2.000000e-01 : f32
    %8 = vector.broadcast %cst_6 : f32 to vector<128x8xf32>
    %9 = arith.mulf %8, %5 : vector<128x8xf32>
    %10 = arith.select %7, %5, %9 : vector<128x8xi1>, vector<128x8xf32>
    %11 = arith.truncf %10 : vector<128x8xf32> to vector<128x8xbf16>
    %c0_7 = arith.constant 0 : index
    %c0_8 = arith.constant 0 : index
    %12 = vector.load %arg4[%c0_7, %c0_8] : memref<128x8xbf16, #tpu.memory_space<vmem>>, vector<128x8xbf16>
    tpu.vector_store %arg4[%c0_7, %c0_8], %11 {strides = array<i32>} : memref<128x8xbf16, #tpu.memory_space<vmem>>, vector<128x8xbf16>,
    return
  }
  func.func @transform_0(%arg0: i32) -> (i32, i32) {
    %c0_i32 = arith.constant 0 : i32
    %c0_i32_0 = arith.constant 0 : i32
    return %arg0, %c0_i32 : i32, i32
  }
  func.func @transform_1(%arg0: i32) -> (i32, i32) {
    %c0_i32 = arith.constant 0 : i32
    %c0_i32_0 = arith.constant 0 : i32
    %c0_i32_1 = arith.constant 0 : i32
    return %c0_i32, %c0_i32_0 : i32, i32
  }
  func.func @transform_2(%arg0: i32) -> (i32, i32) {
    %c0_i32 = arith.constant 0 : i32
    %c0_i32_0 = arith.constant 0 : i32
    %c0_i32_1 = arith.constant 0 : i32
    return %c0_i32, %c0_i32_0 : i32, i32
  }
  func.func @transform_3(%arg0: i32) -> (i32, i32) {
    %c0_i32 = arith.constant 0 : i32
    %c0_i32_0 = arith.constant 0 : i32
    return %arg0, %c0_i32 : i32, i32
  }
}

module attributes {stable_mosaic.version = 11 : i64} {
  func.func @_conv_bn_act_kernel(%arg0: i32, %arg1: memref<32x128xbf16, #tpu.memory_space<vmem>>, %arg2: memref<128x16xbf16, #tpu.memory_space<vmem>>, %arg3: memref<1x16xf32, #tpu.memory_space<vmem>>, %arg4: memref<1x16xf32, #tpu.memory_space<vmem>>, %arg5: memref<32x16xbf16, #tpu.memory_space<vmem>>) attributes {dimension_semantics = [#tpu.dimension_semantics<parallel>], iteration_bounds = array<i64: 1>, scalar_prefetch = 0 : i64, scratch_operands = 0 : i64, tpu.core_type = #tpu.core_type<tc>, window_params = [{transform_indices = @transform_0, window_bounds = array<i64: 32, 128>}, {pipeline_mode = #tpu.pipeline_mode<synchronous>, transform_indices = @transform_1, window_bounds = array<i64: 128, 16>}, {pipeline_mode = #tpu.pipeline_mode<synchronous>, transform_indices = @transform_2, window_bounds = array<i64: 1, 16>}, {pipeline_mode = #tpu.pipeline_mode<synchronous>, transform_indices = @transform_3, window_bounds = array<i64: 1, 16>}, {transform_indices = @transform_4, window_bounds = array<i64: 32, 16>}]} {
    %c0 = arith.constant 0 : index
    %c0_0 = arith.constant 0 : index
    %0 = vector.load %arg1[%c0, %c0_0] : memref<32x128xbf16, #tpu.memory_space<vmem>>, vector<32x128xbf16>
    %c0_1 = arith.constant 0 : index
    %c0_2 = arith.constant 0 : index
    %1 = vector.load %arg2[%c0_1, %c0_2] : memref<128x16xbf16, #tpu.memory_space<vmem>>, vector<128x16xbf16>
    %cst = arith.constant dense<0.000000e+00> : vector<32x16xf32>
    %2 = tpu.matmul %0, %1, %cst {dimension_numbers = #tpu.dot_dimension_numbers<[1], [0], [0], [1], [0, 0, 1, 1], [], []>} : vector<32x128xbf16>, vector<128x16xbf16>, vector<32x16xf32> -> vector<32x16xf32>
    %cst_3 = arith.constant dense<0.000000e+00> : vector<16xf32>
    %3 = vector.multi_reduction <add>, %2, %cst_3 [0] : vector<32x16xf32> to vector<16xf32>
    %4 = vector.shape_cast %3 : vector<16xf32> to vector<1x16xf32>
    %cst_4 = arith.constant 3.125000e-02 : f32
    %5 = vector.broadcast %cst_4 : f32 to vector<1x16xf32>
    %6 = arith.mulf %4, %5 : vector<1x16xf32>
    %7 = arith.mulf %2, %2 : vector<32x16xf32>
    %cst_5 = arith.constant dense<0.000000e+00> : vector<16xf32>
    %8 = vector.multi_reduction <add>, %7, %cst_5 [0] : vector<32x16xf32> to vector<16xf32>
    %9 = vector.shape_cast %8 : vector<16xf32> to vector<1x16xf32>
    %cst_6 = arith.constant 3.125000e-02 : f32
    %10 = vector.broadcast %cst_6 : f32 to vector<1x16xf32>
    %11 = arith.mulf %9, %10 : vector<1x16xf32>
    %12 = arith.mulf %6, %6 : vector<1x16xf32>
    %13 = arith.subf %11, %12 : vector<1x16xf32>
    %cst_7 = arith.constant 0.000000e+00 : f32
    %14 = vector.broadcast %cst_7 : f32 to vector<1x16xf32>
    %15 = arith.maximumf %13, %14 : vector<1x16xf32>
    %c0_8 = arith.constant 0 : index
    %c0_9 = arith.constant 0 : index
    %16 = vector.load %arg3[%c0_8, %c0_9] : memref<1x16xf32, #tpu.memory_space<vmem>>, vector<1x16xf32>
    %cst_10 = arith.constant 9.99999974E-6 : f32
    %17 = vector.broadcast %cst_10 : f32 to vector<1x16xf32>
    %18 = arith.addf %15, %17 : vector<1x16xf32>
    %19 = math.rsqrt %18 : vector<1x16xf32>
    %20 = arith.mulf %16, %19 : vector<1x16xf32>
    %21 = vector.broadcast %6 : vector<1x16xf32> to vector<32x16xf32>
    %22 = arith.subf %2, %21 : vector<32x16xf32>
    %23 = vector.broadcast %20 : vector<1x16xf32> to vector<32x16xf32>
    %24 = arith.mulf %22, %23 : vector<32x16xf32>
    %c0_11 = arith.constant 0 : index
    %c0_12 = arith.constant 0 : index
    %25 = vector.load %arg4[%c0_11, %c0_12] : memref<1x16xf32, #tpu.memory_space<vmem>>, vector<1x16xf32>
    %26 = vector.broadcast %25 : vector<1x16xf32> to vector<32x16xf32>
    %27 = arith.addf %24, %26 : vector<32x16xf32>
    %cst_13 = arith.constant 0.000000e+00 : f32
    %28 = vector.broadcast %cst_13 : f32 to vector<32x16xf32>
    %29 = arith.cmpf ogt, %27, %28 : vector<32x16xf32>
    %cst_14 = arith.constant 2.000000e-01 : f32
    %30 = vector.broadcast %cst_14 : f32 to vector<32x16xf32>
    %31 = arith.mulf %30, %27 : vector<32x16xf32>
    %32 = arith.select %29, %27, %31 : vector<32x16xi1>, vector<32x16xf32>
    %33 = arith.truncf %32 : vector<32x16xf32> to vector<32x16xbf16>
    %c0_15 = arith.constant 0 : index
    %c0_16 = arith.constant 0 : index
    %34 = vector.load %arg5[%c0_15, %c0_16] : memref<32x16xbf16, #tpu.memory_space<vmem>>, vector<32x16xbf16>
    tpu.vector_store %arg5[%c0_15, %c0_16], %33 {strides = array<i32>} : memref<32x16xbf16, #tpu.memory_space<vmem>>, vector<32x16xbf16>,
    return
  }
  func.func @transform_0(%arg0: i32) -> (i32, i32) {
    %c0_i32 = arith.constant 0 : i32
    %c0_i32_0 = arith.constant 0 : i32
    return %arg0, %c0_i32 : i32, i32
  }
  func.func @transform_1(%arg0: i32) -> (i32, i32) {
    %c0_i32 = arith.constant 0 : i32
    %c0_i32_0 = arith.constant 0 : i32
    %c0_i32_1 = arith.constant 0 : i32
    return %c0_i32, %c0_i32_0 : i32, i32
  }
  func.func @transform_2(%arg0: i32) -> (i32, i32) {
    %c0_i32 = arith.constant 0 : i32
    %c0_i32_0 = arith.constant 0 : i32
    %c0_i32_1 = arith.constant 0 : i32
    return %c0_i32, %c0_i32_0 : i32, i32
  }
  func.func @transform_3(%arg0: i32) -> (i32, i32) {
    %c0_i32 = arith.constant 0 : i32
    %c0_i32_0 = arith.constant 0 : i32
    %c0_i32_1 = arith.constant 0 : i32
    return %c0_i32, %c0_i32_0 : i32, i32
  }
  func.func @transform_4(%arg0: i32) -> (i32, i32) {
    %c0_i32 = arith.constant 0 : i32
    %c0_i32_0 = arith.constant 0 : i32
    return %arg0, %c0_i32 : i32, i32
  }
}

module attributes {stable_mosaic.version = 11 : i64} {
  func.func @_conv_bn_act_kernel(%arg0: i32, %arg1: memref<8x256xbf16, #tpu.memory_space<vmem>>, %arg2: memref<256x32xbf16, #tpu.memory_space<vmem>>, %arg3: memref<1x32xf32, #tpu.memory_space<vmem>>, %arg4: memref<1x32xf32, #tpu.memory_space<vmem>>, %arg5: memref<8x32xbf16, #tpu.memory_space<vmem>>) attributes {dimension_semantics = [#tpu.dimension_semantics<parallel>], iteration_bounds = array<i64: 1>, scalar_prefetch = 0 : i64, scratch_operands = 0 : i64, tpu.core_type = #tpu.core_type<tc>, window_params = [{transform_indices = @transform_0, window_bounds = array<i64: 8, 256>}, {pipeline_mode = #tpu.pipeline_mode<synchronous>, transform_indices = @transform_1, window_bounds = array<i64: 256, 32>}, {pipeline_mode = #tpu.pipeline_mode<synchronous>, transform_indices = @transform_2, window_bounds = array<i64: 1, 32>}, {pipeline_mode = #tpu.pipeline_mode<synchronous>, transform_indices = @transform_3, window_bounds = array<i64: 1, 32>}, {transform_indices = @transform_4, window_bounds = array<i64: 8, 32>}]} {
    %c0 = arith.constant 0 : index
    %c0_0 = arith.constant 0 : index
    %0 = vector.load %arg1[%c0, %c0_0] : memref<8x256xbf16, #tpu.memory_space<vmem>>, vector<8x256xbf16>
    %c0_1 = arith.constant 0 : index
    %c0_2 = arith.constant 0 : index
    %1 = vector.load %arg2[%c0_1, %c0_2] : memref<256x32xbf16, #tpu.memory_space<vmem>>, vector<256x32xbf16>
    %cst = arith.constant dense<0.000000e+00> : vector<8x32xf32>
    %2 = tpu.matmul %0, %1, %cst {dimension_numbers = #tpu.dot_dimension_numbers<[1], [0], [0], [1], [0, 0, 1, 1], [], []>} : vector<8x256xbf16>, vector<256x32xbf16>, vector<8x32xf32> -> vector<8x32xf32>
    %cst_3 = arith.constant dense<0.000000e+00> : vector<32xf32>
    %3 = vector.multi_reduction <add>, %2, %cst_3 [0] : vector<8x32xf32> to vector<32xf32>
    %4 = vector.shape_cast %3 : vector<32xf32> to vector<1x32xf32>
    %cst_4 = arith.constant 1.250000e-01 : f32
    %5 = vector.broadcast %cst_4 : f32 to vector<1x32xf32>
    %6 = arith.mulf %4, %5 : vector<1x32xf32>
    %7 = arith.mulf %2, %2 : vector<8x32xf32>
    %cst_5 = arith.constant dense<0.000000e+00> : vector<32xf32>
    %8 = vector.multi_reduction <add>, %7, %cst_5 [0] : vector<8x32xf32> to vector<32xf32>
    %9 = vector.shape_cast %8 : vector<32xf32> to vector<1x32xf32>
    %cst_6 = arith.constant 1.250000e-01 : f32
    %10 = vector.broadcast %cst_6 : f32 to vector<1x32xf32>
    %11 = arith.mulf %9, %10 : vector<1x32xf32>
    %12 = arith.mulf %6, %6 : vector<1x32xf32>
    %13 = arith.subf %11, %12 : vector<1x32xf32>
    %cst_7 = arith.constant 0.000000e+00 : f32
    %14 = vector.broadcast %cst_7 : f32 to vector<1x32xf32>
    %15 = arith.maximumf %13, %14 : vector<1x32xf32>
    %c0_8 = arith.constant 0 : index
    %c0_9 = arith.constant 0 : index
    %16 = vector.load %arg3[%c0_8, %c0_9] : memref<1x32xf32, #tpu.memory_space<vmem>>, vector<1x32xf32>
    %cst_10 = arith.constant 9.99999974E-6 : f32
    %17 = vector.broadcast %cst_10 : f32 to vector<1x32xf32>
    %18 = arith.addf %15, %17 : vector<1x32xf32>
    %19 = math.rsqrt %18 : vector<1x32xf32>
    %20 = arith.mulf %16, %19 : vector<1x32xf32>
    %21 = vector.broadcast %6 : vector<1x32xf32> to vector<8x32xf32>
    %22 = arith.subf %2, %21 : vector<8x32xf32>
    %23 = vector.broadcast %20 : vector<1x32xf32> to vector<8x32xf32>
    %24 = arith.mulf %22, %23 : vector<8x32xf32>
    %c0_11 = arith.constant 0 : index
    %c0_12 = arith.constant 0 : index
    %25 = vector.load %arg4[%c0_11, %c0_12] : memref<1x32xf32, #tpu.memory_space<vmem>>, vector<1x32xf32>
    %26 = vector.broadcast %25 : vector<1x32xf32> to vector<8x32xf32>
    %27 = arith.addf %24, %26 : vector<8x32xf32>
    %cst_13 = arith.constant 0.000000e+00 : f32
    %28 = vector.broadcast %cst_13 : f32 to vector<8x32xf32>
    %29 = arith.cmpf ogt, %27, %28 : vector<8x32xf32>
    %cst_14 = arith.constant 2.000000e-01 : f32
    %30 = vector.broadcast %cst_14 : f32 to vector<8x32xf32>
    %31 = arith.mulf %30, %27 : vector<8x32xf32>
    %32 = arith.select %29, %27, %31 : vector<8x32xi1>, vector<8x32xf32>
    %33 = arith.truncf %32 : vector<8x32xf32> to vector<8x32xbf16>
    %c0_15 = arith.constant 0 : index
    %c0_16 = arith.constant 0 : index
    %34 = vector.load %arg5[%c0_15, %c0_16] : memref<8x32xbf16, #tpu.memory_space<vmem>>, vector<8x32xbf16>
    tpu.vector_store %arg5[%c0_15, %c0_16], %33 {strides = array<i32>} : memref<8x32xbf16, #tpu.memory_space<vmem>>, vector<8x32xbf16>,
    return
  }
  func.func @transform_0(%arg0: i32) -> (i32, i32) {
    %c0_i32 = arith.constant 0 : i32
    %c0_i32_0 = arith.constant 0 : i32
    return %arg0, %c0_i32 : i32, i32
  }
  func.func @transform_1(%arg0: i32) -> (i32, i32) {
    %c0_i32 = arith.constant 0 : i32
    %c0_i32_0 = arith.constant 0 : i32
    %c0_i32_1 = arith.constant 0 : i32
    return %c0_i32, %c0_i32_0 : i32, i32
  }
  func.func @transform_2(%arg0: i32) -> (i32, i32) {
    %c0_i32 = arith.constant 0 : i32
    %c0_i32_0 = arith.constant 0 : i32
    %c0_i32_1 = arith.constant 0 : i32
    return %c0_i32, %c0_i32_0 : i32, i32
  }
  func.func @transform_3(%arg0: i32) -> (i32, i32) {
    %c0_i32 = arith.constant 0 : i32
    %c0_i32_0 = arith.constant 0 : i32
    %c0_i32_1 = arith.constant 0 : i32
    return %c0_i32, %c0_i32_0 : i32, i32
  }
  func.func @transform_4(%arg0: i32) -> (i32, i32) {
    %c0_i32 = arith.constant 0 : i32
    %c0_i32_0 = arith.constant 0 : i32
    return %arg0, %c0_i32 : i32, i32
  }
}

module attributes {stable_mosaic.version = 11 : i64} {
  func.func @_conv_act_kernel(%arg0: i32, %arg1: memref<8x512xbf16, #tpu.memory_space<vmem>>, %arg2: memref<512x1xbf16, #tpu.memory_space<vmem>>, %arg3: memref<1x1xf32, #tpu.memory_space<vmem>>, %arg4: memref<8x1xf32, #tpu.memory_space<vmem>>) attributes {dimension_semantics = [#tpu.dimension_semantics<parallel>], iteration_bounds = array<i64: 1>, scalar_prefetch = 0 : i64, scratch_operands = 0 : i64, tpu.core_type = #tpu.core_type<tc>, window_params = [{transform_indices = @transform_0, window_bounds = array<i64: 8, 512>}, {pipeline_mode = #tpu.pipeline_mode<synchronous>, transform_indices = @transform_1, window_bounds = array<i64: 512, 1>}, {pipeline_mode = #tpu.pipeline_mode<synchronous>, transform_indices = @transform_2, window_bounds = array<i64: 1, 1>}, {transform_indices = @transform_3, window_bounds = array<i64: 8, 1>}]} {
    %c0 = arith.constant 0 : index
    %c0_0 = arith.constant 0 : index
    %0 = vector.load %arg1[%c0, %c0_0] : memref<8x512xbf16, #tpu.memory_space<vmem>>, vector<8x512xbf16>
    %c0_1 = arith.constant 0 : index
    %c0_2 = arith.constant 0 : index
    %1 = vector.load %arg2[%c0_1, %c0_2] : memref<512x1xbf16, #tpu.memory_space<vmem>>, vector<512x1xbf16>
    %cst = arith.constant dense<0.000000e+00> : vector<8x1xf32>
    %2 = tpu.matmul %0, %1, %cst {dimension_numbers = #tpu.dot_dimension_numbers<[1], [0], [0], [1], [0, 0, 1, 1], [], []>} : vector<8x512xbf16>, vector<512x1xbf16>, vector<8x1xf32> -> vector<8x1xf32>
    %c0_3 = arith.constant 0 : index
    %c0_4 = arith.constant 0 : index
    %3 = vector.load %arg3[%c0_3, %c0_4] : memref<1x1xf32, #tpu.memory_space<vmem>>, vector<1x1xf32>
    %4 = vector.broadcast %3 : vector<1x1xf32> to vector<8x1xf32>
    %5 = arith.addf %2, %4 : vector<8x1xf32>
    %c0_5 = arith.constant 0 : index
    %c0_6 = arith.constant 0 : index
    %6 = vector.load %arg4[%c0_5, %c0_6] : memref<8x1xf32, #tpu.memory_space<vmem>>, vector<8x1xf32>
    tpu.vector_store %arg4[%c0_5, %c0_6], %5 {strides = array<i32>} : memref<8x1xf32, #tpu.memory_space<vmem>>, vector<8x1xf32>,
    return
  }
  func.func @transform_0(%arg0: i32) -> (i32, i32) {
    %c0_i32 = arith.constant 0 : i32
    %c0_i32_0 = arith.constant 0 : i32
    return %arg0, %c0_i32 : i32, i32
  }
  func.func @transform_1(%arg0: i32) -> (i32, i32) {
    %c0_i32 = arith.constant 0 : i32
    %c0_i32_0 = arith.constant 0 : i32
    %c0_i32_1 = arith.constant 0 : i32
    return %c0_i32, %c0_i32_0 : i32, i32
  }
  func.func @transform_2(%arg0: i32) -> (i32, i32) {
    %c0_i32 = arith.constant 0 : i32
    %c0_i32_0 = arith.constant 0 : i32
    %c0_i32_1 = arith.constant 0 : i32
    return %c0_i32, %c0_i32_0 : i32, i32
  }
  func.func @transform_3(%arg0: i32) -> (i32, i32) {
    %c0_i32 = arith.constant 0 : i32
    %c0_i32_0 = arith.constant 0 : i32
    return %arg0, %c0_i32 : i32, i32
  }
}

</mosaic_0001>

<bundles_post_ra>
// kernel: discriminator_forward.4
= control target key start
LH: loop header
LB: loop body
LE: loop exit
PB: predicated region body
PF: predicated region fallthrough
CT: control target
= control target key end

     0   :  { %vm102_vm0 = vcmask 392192   ;;  %vm336_vm1 = vcmask 60416   ;;  %s605_s1 = inlined_call_operand.vmem [shape: bf16[48,8], index: 1, kind: input, shape index: {}]   ;;  %s606_s0 = inlined_call_operand.vmem [shape: bf16[128,48], index: 0, kind: input, shape index: {}]   ;;  %s607_s2 = inlined_call_operand.vmem [shape: f32[1,8], index: 2, kind: input, shape index: {}]   ;;  %s608_s3 = inlined_call_operand.vmem [shape: bf16[128,8], index: 3, kind: output, shape index: {}]  }
   0x1   :  { %v448_v0 = vld [vmem:[%s605_s1] sm:$0xff]   ;;  %v449_v1 = vld [vmem:[%s605_s1 + $0x8] sm:$0xff]   ;;  %v450_v2 = vld [vmem:[%s605_s1 + $0x10] sm:$0xff]  }
   0x2   :  { %420 = vmatprep.subr.bf16.mxu0 %v448_v0  ;;  %442 = vmatprep.subr.bf16.mxu1 %v448_v0  ;;  %v451_v3 = vld [vmem:[%s606_s0] sm:$0xff]   ;;  %v453_v5 = vld [vmem:[%s606_s0 + $0x8] sm:$0xff]   ;;  %v455_v7 = vld [vmem:[%s606_s0 + $0x10] sm:$0xff]  }
   0x3   :  { %421 = vmatpush3.bf16.msra.mxu0 %v448_v0  ;;  %445 = vmatpush3.bf16.msra.mxu1 %v448_v0  ;;  %v452_v4 = vld [vmem:[%s606_s0 + $0x20] sm:$0xff]   ;;  %v454_v6 = vld [vmem:[%s606_s0 + $0x28] sm:$0xff]   ;;  %v456_v8 = vld [vmem:[%s606_s0 + $0x30] sm:$0xff]  }
   0x4   :  { %422 = vmatprep.subr.bf16.mxu0 %v449_v1  ;;  %443 = vmatprep.subr.bf16.mxu1 %v449_v1  ;;  %v457_v9 = vld [vmem:[%s606_s0 + $0x18] sm:$0xff]   ;;  %v523_v11 = vld [vmem:[%s607_s2] ss:$0 sm:$0xff] }
   0x5   :  { %426 = vmatprep.mubr.msk.bf16.mxu0 %vm102_vm0, %v451_v3  ;;  %434 = vmatprep.mubr.msk.bf16.mxu1 %vm102_vm0, %v452_v4  ;;  %v458_v10 = vld [vmem:[%s606_s0 + $0x38] sm:$0xff]  }
   0x7   :  { %423 = vmatpush3.bf16.msra.mxu0 %v449_v1  ;;  %446 = vmatpush3.bf16.msra.mxu1 %v449_v1 }
   0x8   :  { %424 = vmatprep.subr.bf16.mxu0 %v450_v2  ;;  %444 = vmatprep.subr.bf16.mxu1 %v450_v2 }
   0xb   :  { %425 = vmatpush3.bf16.msra.mxu0 %v450_v2  ;;  %447 = vmatpush3.bf16.msra.mxu1 %v450_v2 }
   0xe   :  { %427 = vmatmul.mubr.msk.bf16.vlgmr.msra.gmra.mrb[0].mxu0 %vm102_vm0, %v453_v5  ;;  %435 = vmatmul.mubr.msk.bf16.vlgmr.msra.gmra.mrb[0].mxu1 %vm102_vm0, %v454_v6 }
   0xf   :  { %430 = vmatprep.mubr.msk.bf16.mxu0 %vm102_vm0, %v455_v7  ;;  %438 = vmatprep.mubr.msk.bf16.mxu1 %vm102_vm0, %v456_v8 }
  0x16   :  { %431 = vmatmul.mubr.msk.bf16.gmra.mrb[4].mxu0 %vm102_vm0, %v457_v9  ;;  %439 = vmatmul.mubr.msk.bf16.gmra.mrb[4].mxu1 %vm102_vm0, %v458_v10 }
  0xe1   :  { %v428_v12 = vpop.f32.mrb[0].mxu0  ;;  %v436_v13 = vpop.f32.mrb[0].mxu1 }
  0xe2   :  { %v170_v14 = vadd.f32 %v428_v12, %v523_v11  ;;  %v202_v15 = vadd.f32 %v436_v13, %v523_v11  ;;  %v161_v16 = vpop.f32.mrb[1].mxu0  ;;  %v193_v17 = vpop.f32.mrb[1].mxu1 }
  0xe3   :  { %v162_v18 = vadd.f32 %v523_v11, %v161_v16  ;;  %v194_v19 = vadd.f32 %v523_v11, %v193_v17  ;;  %v429_v20 = vpop.f32.mrb[2].mxu0  ;;  %v437_v21 = vpop.f32.mrb[2].mxu1 }
  0xe4   :  { %vm226_vm2 = vcmp.gt.f32.partialorder %v170_v14, 0.0  ;;  %v242_v22 = vmul.f32 0.2, %v170_v14  ;;  %vm234_vm3 = vcmp.gt.f32.partialorder %v202_v15, 0.0  ;;  %v250_v23 = vmul.f32 0.2, %v202_v15 }
  0xe5   :  { %vm224_vm4 = vcmp.gt.f32.partialorder %v162_v18, 0.0  ;;  %v240_v24 = vmul.f32 0.2, %v162_v18  ;;  %vm232_vm5 = vcmp.gt.f32.partialorder %v194_v19, 0.0  ;;  %v248_v25 = vmul.f32 0.2, %v194_v19 }
  0xe6   :  { %v258_v26 = vsel %vm226_vm2, %v170_v14, %v242_v22  ;;  %v266_v27 = vsel %vm234_vm3, %v202_v15, %v250_v23  ;;  %v173_v28 = vadd.f32 %v429_v20, %v523_v11  ;;  %v205_v29 = vadd.f32 %v437_v21, %v523_v11  ;;  %v164_v30 = vpop.f32.mrb[3].mxu0  ;;  %v196_v31 = vpop.f32.mrb[3].mxu1 }
  0xe7   :  { %v395_v32 = vpack.c.bf16 %v258_v26, %v258_v26  ;;  %v403_v33 = vpack.c.bf16 %v266_v27, %v266_v27  ;;  %v256_v34 = vsel %vm224_vm4, %v162_v18, %v240_v24  ;;  %v264_v35 = vsel %vm232_vm5, %v194_v19, %v248_v25 }
  0xe8   :  { %v393_v36 = vpack.c.bf16 %v256_v34, %v256_v34  ;;  %v401_v37 = vpack.c.bf16 %v264_v35, %v264_v35  ;;  %vm227_vm6 = vcmp.gt.f32.partialorder %v173_v28, 0.0  ;;  %v243_v38 = vmul.f32 0.2, %v173_v28 }
  0xe9   :  { %339 = vst.msk [vmem:[%s608_s3 + $0x8] sm:$0xf] %vm336_vm1, %v395_v32  ;;  %347 = vst.msk [vmem:[%s608_s3 + $0x28] sm:$0xf] %vm336_vm1, %v403_v33  ;;  %vm235_vm7 = vcmp.gt.f32.partialorder %v205_v29, 0.0  ;;  %v165_v40 = vadd.f32 %v523_v11, %v164_v30  ;;  %v197_v41 = vadd.f32 %v523_v11, %v196_v31  ;;  %v432_v42 = vpop.f32.mrb[4].mxu0 }
  0xea   :  { %v251_v39 = vmul.f32 0.2, %v205_v29  ;;  %v440_v43 = vpop.f32.mrb[4].mxu1  ;;  %337 = vst.msk [vmem:[%s608_s3] sm:$0xf] %vm336_vm1, %v393_v36  ;;  %v259_v44 = vsel %vm227_vm6, %v173_v28, %v243_v38  ;;  %v186_v45 = vadd.f32 %v432_v42, %v523_v11  ;;  %v177_v47 = vpop.f32.mrb[5].mxu0 }
  0xeb   :  { %345 = vst.msk [vmem:[%s608_s3 + $0x20] sm:$0xf] %vm336_vm1, %v401_v37  ;;  %v218_v46 = vadd.f32 %v440_v43, %v523_v11  ;;  %v209_v48 = vpop.f32.mrb[5].mxu1  ;;  %v396_v49 = vpack.c.bf16 %v259_v44, %v259_v44  ;;  %vm225_vm8 = vcmp.gt.f32.partialorder %v165_v40, 0.0  ;;  %v241_v51 = vmul.f32 0.2, %v165_v40 }
  0xec   :  { %v267_v50 = vsel %vm235_vm7, %v205_v29, %v251_v39  ;;  %v433_v52 = vpop.f32.mrb[6].mxu0  ;;  %v441_v53 = vpop.f32.mrb[6].mxu1  ;;  %vm233_vm9 = vcmp.gt.f32.partialorder %v197_v41, 0.0  ;;  %v249_v55 = vmul.f32 0.2, %v197_v41  ;;  %vm230_vm10 = vcmp.gt.f32.partialorder %v186_v45, 0.0 }
  0xed   :  { %v404_v54 = vpack.c.bf16 %v267_v50, %v267_v50  ;;  %v180_v56 = vpop.f32.mrb[7].mxu0  ;;  %v212_v57 = vpop.f32.mrb[7].mxu1  ;;  %340 = vst.msk [vmem:[%s608_s3 + $0xc] sm:$0xf] %vm336_vm1, %v396_v49  ;;  %v257_v58 = vsel %vm225_vm8, %v165_v40, %v241_v51  ;;  %v246_v59 = vmul.f32 0.2, %v186_v45  ;;  %v178_v63 = vadd.f32 %v523_v11, %v177_v47 }
  0xee   :  { %vm238_vm11 = vcmp.gt.f32.partialorder %v218_v46, 0.0  ;;  %v254_v60 = vmul.f32 0.2, %v218_v46  ;;  %v394_v61 = vpack.c.bf16 %v257_v58, %v257_v58  ;;  %v265_v62 = vsel %vm233_vm9, %v197_v41, %v249_v55 }
  0xef   :  { %348 = vst.msk [vmem:[%s608_s3 + $0x2c] sm:$0xf] %vm336_vm1, %v404_v54  ;;  %v210_v0 = vadd.f32 %v523_v11, %v209_v48  ;;  %v402_v1 = vpack.c.bf16 %v265_v62, %v265_v62  ;;  %v262_v2 = vsel %vm230_vm10, %v186_v45, %v246_v59  ;;  %v189_v4 = vadd.f32 %v433_v52, %v523_v11 }
  0xf0   :  { %v270_v3 = vsel %vm238_vm11, %v218_v46, %v254_v60  ;;  %338 = vst.msk [vmem:[%s608_s3 + $0x4] sm:$0xf] %vm336_vm1, %v394_v61  ;;  %v399_v5 = vpack.c.bf16 %v262_v2, %v262_v2  ;;  %vm228_vm12 = vcmp.gt.f32.partialorder %v178_v63, 0.0  ;;  %v244_v7 = vmul.f32 0.2, %v178_v63 }
  0xf1   :  { %v407_v6 = vpack.c.bf16 %v270_v3, %v270_v3  ;;  %346 = vst.msk [vmem:[%s608_s3 + $0x24] sm:$0xf] %vm336_vm1, %v402_v1  ;;  %vm236_vm13 = vcmp.gt.f32.partialorder %v210_v0, 0.0  ;;  %v252_v8 = vmul.f32 0.2, %v210_v0  ;;  %vm231_vm14 = vcmp.gt.f32.partialorder %v189_v4, 0.0 }
  0xf2   :  { %v247_v9 = vmul.f32 0.2, %v189_v4  ;;  %343 = vst.msk [vmem:[%s608_s3 + $0x18] sm:$0xf] %vm336_vm1, %v399_v5  ;;  %v260_v10 = vsel %vm228_vm12, %v178_v63, %v244_v7  ;;  %v221_v12 = vadd.f32 %v441_v53, %v523_v11  ;;  %v181_v13 = vadd.f32 %v523_v11, %v180_v56 }
  0xf3   :  { %351 = vst.msk [vmem:[%s608_s3 + $0x38] sm:$0xf] %vm336_vm1, %v407_v6  ;;  %v213_v14 = vadd.f32 %v523_v11, %v212_v57  ;;  %v397_v15 = vpack.c.bf16 %v260_v10, %v260_v10  ;;  %v268_v16 = vsel %vm236_vm13, %v210_v0, %v252_v8 }
  0xf4   :  { %v263_v17 = vsel %vm231_vm14, %v189_v4, %v247_v9  ;;  %v405_v18 = vpack.c.bf16 %v268_v16, %v268_v16  ;;  %vm239_vm15 = vcmp.gt.f32.partialorder %v221_v12, 0.0  ;;  %v255_v20 = vmul.f32 0.2, %v221_v12 }
  0xf5   :  { %v400_v19 = vpack.c.bf16 %v263_v17, %v263_v17  ;;  %341 = vst.msk [vmem:[%s608_s3 + $0x10] sm:$0xf] %vm336_vm1, %v397_v15  ;;  %vm229_vm0 = vcmp.gt.f32.partialorder %v181_v13, 0.0  ;;  %v245_v21 = vmul.f32 0.2, %v181_v13  ;;  %vm237_vm2 = vcmp.gt.f32.partialorder %v213_v14, 0.0 }
  0xf6   :  { %v253_v22 = vmul.f32 0.2, %v213_v14  ;;  %349 = vst.msk [vmem:[%s608_s3 + $0x30] sm:$0xf] %vm336_vm1, %v405_v18  ;;  %v271_v11 = vsel %vm239_vm15, %v221_v12, %v255_v20 }
  0xf7   :  { %344 = vst.msk [vmem:[%s608_s3 + $0x1c] sm:$0xf] %vm336_vm1, %v400_v19  ;;  %v408_v23 = vpack.c.bf16 %v271_v11, %v271_v11  ;;  %v261_v24 = vsel %vm229_vm0, %v181_v13, %v245_v21 }
  0xf8   :  { %v269_v25 = vsel %vm237_vm2, %v213_v14, %v253_v22  ;;  %v398_v26 = vpack.c.bf16 %v261_v24, %v261_v24 }
  0xf9   :  { %v406_v27 = vpack.c.bf16 %v269_v25, %v269_v25  ;;  %352 = vst.msk [vmem:[%s608_s3 + $0x3c] sm:$0xf] %vm336_vm1, %v408_v23 }
  0xfa   :  { %342 = vst.msk [vmem:[%s608_s3 + $0x14] sm:$0xf] %vm336_vm1, %v398_v26 }
  0xfb   :  { %350 = vst.msk [vmem:[%s608_s3 + $0x34] sm:$0xf] %vm336_vm1, %v406_v27 }

// kernel: discriminator_forward.5
= control target key start
LH: loop header
LB: loop body
LE: loop exit
PB: predicated region body
PF: predicated region fallthrough
CT: control target
= control target key end

     0   :  { %vm147_vm0 = vcmask 130048   ;;  %v192_v54 = vlaneseq  ;;  %vm240_vm5 = vcmask 125952   ;;  %s391_s1 = inlined_call_operand.vmem [shape: bf16[128,16], index: 1, kind: input, shape index: {}]   ;;  %s392_s0 = inlined_call_operand.vmem [shape: bf16[32,128], index: 0, kind: input, shape index: {}]   ;;  %s393_s2 = inlined_call_operand.vmem [shape: f32[1,16], index: 2, kind: input, shape index: {}]   ;;  %s394_s3 = inlined_call_operand.vmem [shape: f32[1,16], index: 3, kind: input, shape index: {}]   ;;  %s395_s4 = inlined_call_operand.vmem [shape: bf16[32,16], index: 4, kind: output, shape index: {}]  }
   0x1   :  { %v298_v0 = vld [vmem:[%s391_s1] sm:$0xff]   ;;  %v299_v1 = vld [vmem:[%s391_s1 + $0x8] sm:$0xff]   ;;  %v300_v2 = vld [vmem:[%s391_s1 + $0x10] sm:$0xff]  }
   0x2   :  { %278 = vmatprep.subr.bf16.mxu0 %v298_v0  ;;  %v301_v3 = vld [vmem:[%s391_s1 + $0x18] sm:$0xff]   ;;  %v306_v4 = vld [vmem:[%s392_s0] sm:$0xff]   ;;  %v303_v6 = vld [vmem:[%s391_s1 + $0x28] sm:$0xff]   ;;  %v193_v55 = vshrl.u32 %v192_v54, 7 }
   0x3   :  { %279 = vmatpush3.bf16.msra.mxu0 %v298_v0  ;;  %294 = vmatprep.mubr.bf16.mxu0 %v306_v4  ;;  %v302_v5 = vld [vmem:[%s391_s1 + $0x20] sm:$0xff]   ;;  %v304_v7 = vld [vmem:[%s391_s1 + $0x30] sm:$0xff]   ;;  %v305_v8 = vld [vmem:[%s391_s1 + $0x38] sm:$0xff]  }
   0x4   :  { %280 = vmatprep.subr.bf16.mxu0 %v299_v1  ;;  %v307_v9 = vld [vmem:[%s392_s0 + $0x8] sm:$0xff]   ;;  %v183_v56 = vld [vmem:[%s393_s2] sm:$0x1]  ;;  %v194_v57 = vsub.s32 0, %v193_v55 }
   0x5   :  { %v259_v61 = vld [vmem:[%s394_s3] ss:$0 sm:$0xff] }
   0x7   :  { %281 = vmatpush3.bf16.msra.mxu0 %v299_v1 }
   0x8   :  { %282 = vmatprep.subr.bf16.mxu0 %v300_v2 }
   0xb   :  { %283 = vmatpush3.bf16.msra.mxu0 %v300_v2 }
   0xc   :  { %284 = vmatprep.subr.bf16.mxu0 %v301_v3 }
   0xf   :  { %285 = vmatpush3.bf16.msra.mxu0 %v301_v3 }
  0x10   :  { %286 = vmatprep.subr.bf16.mxu0 %v302_v5 }
  0x13   :  { %287 = vmatpush3.bf16.msra.mxu0 %v302_v5 }
  0x14   :  { %288 = vmatprep.subr.bf16.mxu0 %v303_v6 }
  0x17   :  { %289 = vmatpush3.bf16.msra.mxu0 %v303_v6 }
  0x18   :  { %290 = vmatprep.subr.bf16.mxu0 %v304_v7 }
  0x1b   :  { %291 = vmatpush3.bf16.msra.mxu0 %v304_v7 }
  0x1c   :  { %292 = vmatprep.subr.bf16.mxu0 %v305_v8 }
  0x1f   :  { %293 = vmatpush3.bf16.msra.mxu0 %v305_v8 }
  0x22   :  { %295 = vmatmul.mubr.bf16.vlgmr.msra.gmra.mrb[0].mxu0 %v307_v9 }
  0xf5   :  { %v296_v10 = vpop.f32.mrb[0].mxu0 }
  0xf6   :  { %v132_v11 = vpop.f32.mrb[1].mxu0  ;;  %v164_v15 = vmul.f32 %v296_v10, %v296_v10  ;;  %v151_v20 = vsel %vm147_vm0, %v296_v10, 0.0 }
  0xf7   :  { %v162_v12 = vmul.f32 %v132_v11, %v132_v11  ;;  %v297_v13 = vpop.f32.mrb[2].mxu0  ;;  %v148_v16 = vsel %vm147_vm0, %v132_v11, 0.0 }
  0xf8   :  { %v135_v14 = vpop.f32.mrb[3].mxu0  ;;  %v165_v22 = vmul.f32 %v297_v13, %v297_v13  ;;  %v169_v26 = vsel %vm147_vm0, %v164_v15, 0.0  ;;  %v153_v27 = vsel %vm147_vm0, %v297_v13, 0.0 }
  0xf9   :  { %v149_v17 = vsel %vm147_vm0, %v135_v14, 0.0  ;;  %v163_v18 = vmul.f32 %v135_v14, %v135_v14  ;;  %v166_v21 = vsel %vm147_vm0, %v162_v12, 0.0 }
  0xfa   :  { %v150_v19 = vadd.f32 %v149_v17, %v148_v16  ;;  %v171_v30 = vsel %vm147_vm0, %v165_v22, 0.0 }
  0xfb   :  { %v167_v23 = vsel %vm147_vm0, %v163_v18, 0.0 }
  0xfc   :  { %v152_v24 = vadd.f32 %v151_v20, %v150_v19  ;;  %v168_v25 = vadd.f32 %v167_v23, %v166_v21 }
  0xfe   :  { %v154_v28 = vadd.f32 %v153_v27, %v152_v24  ;;  %v170_v29 = vadd.f32 %v169_v26, %v168_v25 }
 0x100   :  { %v155_v31 = vrot.slane %v154_v28, 4  ;;  %v172_v32 = vadd.f32 %v171_v30, %v170_v29 }
 0x102   :  { %v156_v33 = vadd.f32 %v155_v31, %v154_v28  ;;  %v173_v34 = vrot.slane %v172_v32, 4 }
 0x104   :  { %v157_v35 = vrot.slane %v156_v33, 2  ;;  %v174_v36 = vadd.f32 %v173_v34, %v172_v32 }
 0x106   :  { %v158_v37 = vadd.f32 %v157_v35, %v156_v33  ;;  %v175_v38 = vrot.slane %v174_v36, 2 }
 0x108   :  { %v159_v39 = vrot.slane %v158_v37, 1  ;;  %v176_v40 = vadd.f32 %v175_v38, %v174_v36 }
 0x10a   :  { %v160_v41 = vadd.f32 %v159_v39, %v158_v37  ;;  %v177_v42 = vrot.slane %v176_v40, 1 }
 0x10c   :  { %v161_v43 = vmul.f32 0.03125, %v160_v41  ;;  %v178_v44 = vadd.f32 %v177_v42, %v176_v40 }
 0x10e   :  { %v179_v45 = vmul.f32 0.03125, %v178_v44  ;;  %v180_v46 = vmul.f32 %v161_v43, %v161_v43  ;;  %v187_v47 = vsub.f32 %v132_v11, %v161_v43  ;;  %v188_v48 = vsub.f32 %v135_v14, %v161_v43 }
 0x10f   :  { %v189_v49 = vsub.f32 %v296_v10, %v161_v43  ;;  %v190_v50 = vsub.f32 %v297_v13, %v161_v43 }
 0x110   :  { %v181_v51 = vsub.f32 %v179_v45, %v180_v46 }
 0x112   :  { %v182_v52 = vmax.f32 %v181_v51, 0.0 }
 0x114   :  { %v184_v53 = vadd.f32 1e-05, %v182_v52 }
 0x116   :  { %308 = vrsqrt.f32 %v184_v53 }
 0x120   :  { %v309_v58 = vpop.eup %308 }
 0x121   :  { %v186_v59 = vmul.f32 %v309_v58, %v183_v56 }
 0x123   :  { %v195_v60 = vrot.slane %v186_v59, %v194_v57 }
 0x125   :  { %v197_v62 = vmul.f32 %v195_v60, %v187_v47  ;;  %v198_v63 = vmul.f32 %v195_v60, %v188_v48  ;;  %v199_v0 = vmul.f32 %v195_v60, %v189_v49  ;;  %v200_v1 = vmul.f32 %v195_v60, %v190_v50 }
 0x127   :  { %v208_v2 = vadd.f32 %v259_v61, %v197_v62  ;;  %v209_v3 = vadd.f32 %v259_v61, %v198_v63  ;;  %v210_v4 = vadd.f32 %v259_v61, %v199_v0  ;;  %v211_v5 = vadd.f32 %v259_v61, %v200_v1 }
 0x129   :  { %vm212_vm1 = vcmp.gt.f32.partialorder %v208_v2, 0.0  ;;  %vm213_vm2 = vcmp.gt.f32.partialorder %v209_v3, 0.0  ;;  %vm214_vm3 = vcmp.gt.f32.partialorder %v210_v4, 0.0  ;;  %vm215_vm4 = vcmp.gt.f32.partialorder %v211_v5, 0.0 }
 0x12a   :  { %v216_v6 = vmul.f32 0.2, %v208_v2  ;;  %v217_v7 = vmul.f32 0.2, %v209_v3  ;;  %v218_v8 = vmul.f32 0.2, %v210_v4 }
 0x12b   :  { %v219_v9 = vmul.f32 0.2, %v211_v5 }
 0x12c   :  { %v220_v10 = vsel %vm212_vm1, %v208_v2, %v216_v6  ;;  %v221_v11 = vsel %vm213_vm2, %v209_v3, %v217_v7  ;;  %v222_v12 = vsel %vm214_vm3, %v210_v4, %v218_v8 }
 0x12d   :  { %v223_v13 = vsel %vm215_vm4, %v211_v5, %v219_v9  ;;  %v264_v14 = vpack.c.bf16 %v220_v10, %v220_v10  ;;  %v265_v15 = vpack.c.bf16 %v221_v11, %v221_v11  ;;  %v266_v16 = vpack.c.bf16 %v222_v12, %v222_v12 }
 0x12e   :  { %v267_v17 = vpack.c.bf16 %v223_v13, %v223_v13 }
 0x12f   :  { %241 = vst.msk [vmem:[%s395_s4] sm:$0xf] %vm240_vm5, %v264_v14  ;;  %242 = vst.msk [vmem:[%s395_s4 + $0x4] sm:$0xf] %vm240_vm5, %v265_v15 }
 0x130   :  { %243 = vst.msk [vmem:[%s395_s4 + $0x8] sm:$0xf] %vm240_vm5, %v266_v16  ;;  %244 = vst.msk [vmem:[%s395_s4 + $0xc] sm:$0xf] %vm240_vm5, %v267_v17 }

// kernel: discriminator_forward.6
= control target key start
LH: loop header
LB: loop body
LE: loop exit
PB: predicated region body
PF: predicated region fallthrough
CT: control target
= control target key end

     0   :  { %vm194_vm0 = vcmask 261120   ;;  %v221_v45 = vlaneseq  ;;  %vm239_vm2 = vcmask 257024   ;;  %s391_s1 = inlined_call_operand.vmem [shape: bf16[256,32], index: 1, kind: input, shape index: {}]   ;;  %s392_s0 = inlined_call_operand.vmem [shape: bf16[8,256], index: 0, kind: input, shape index: {}]   ;;  %s393_s2 = inlined_call_operand.vmem [shape: f32[1,32], index: 2, kind: input, shape index: {}]   ;;  %s394_s3 = inlined_call_operand.vmem [shape: f32[1,32], index: 3, kind: input, shape index: {}]   ;;  %s395_s4 = inlined_call_operand.vmem [shape: bf16[8,32], index: 4, kind: output, shape index: {}]  }
   0x1   :  { %v286_v0 = vld [vmem:[%s391_s1 + $0x40] sm:$0xff]   ;;  %v288_v2 = vld [vmem:[%s391_s1 + $0x48] sm:$0xff]   ;;  %v290_v4 = vld [vmem:[%s391_s1 + $0x50] sm:$0xff]  }
   0x2   :  { %v287_v1 = vld [vmem:[%s391_s1] sm:$0xff]   ;;  %264 = vmatprep.subr.bf16.mxu0 %v286_v0  ;;  %v289_v3 = vld [vmem:[%s391_s1 + $0x8] sm:$0xff]   ;;  %v291_v5 = vld [vmem:[%s391_s1 + $0x10] sm:$0xff]   ;;  %v222_v46 = vshrl.u32 %v221_v45, 7 }
   0x3   :  { %265 = vmatpush3.bf16.msra.mxu0 %v287_v1  ;;  %v292_v6 = vld [vmem:[%s391_s1 + $0x58] sm:$0xff]   ;;  %v294_v8 = vld [vmem:[%s391_s1 + $0x60] sm:$0xff]   ;;  %v296_v10 = vld [vmem:[%s391_s1 + $0x68] sm:$0xff]  }
   0x4   :  { %266 = vmatprep.subr.bf16.mxu0 %v288_v2  ;;  %v293_v7 = vld [vmem:[%s391_s1 + $0x18] sm:$0xff]   ;;  %v295_v9 = vld [vmem:[%s391_s1 + $0x20] sm:$0xff]   ;;  %v297_v13 = vld [vmem:[%s391_s1 + $0x28] sm:$0xff]   ;;  %v223_v48 = vsub.s32 0, %v222_v46 }
   0x5   :  { %v18_v11 = vld [vmem:[%s392_s0] sm:$0xff]  ;;  %v298_v14 = vld [vmem:[%s391_s1 + $0x70] sm:$0xff]   ;;  %v300_v16 = vld [vmem:[%s391_s1 + $0x78] sm:$0xff]  }
   0x6   :  { %v246_v12 = vcombine.high %v18_v11, %v18_v11  ;;  %v299_v15 = vld [vmem:[%s391_s1 + $0x30] sm:$0xff]   ;;  %v301_v17 = vld [vmem:[%s391_s1 + $0x38] sm:$0xff]   ;;  %v245_v18 = vcombine.low %v18_v11, %v18_v11  ;;  %v215_v47 = vld [vmem:[%s393_s2] sm:$0x1] }
   0x7   :  { %267 = vmatpush3.bf16.msra.mxu0 %v289_v3  ;;  %v263_v53 = vld [vmem:[%s394_s3] ss:$0 sm:$0xff] }
   0x8   :  { %268 = vmatprep.subr.bf16.mxu0 %v290_v4  ;;  %186 = vmatprep.mubr.bf16.mxu0 %v246_v12 }
   0xb   :  { %269 = vmatpush3.bf16.msra.mxu0 %v291_v5 }
   0xc   :  { %270 = vmatprep.subr.bf16.mxu0 %v292_v6 }
   0xf   :  { %271 = vmatpush3.bf16.msra.mxu0 %v293_v7 }
  0x10   :  { %272 = vmatprep.subr.bf16.mxu0 %v294_v8 }
  0x13   :  { %273 = vmatpush3.bf16.msra.mxu0 %v295_v9 }
  0x14   :  { %274 = vmatprep.subr.bf16.mxu0 %v296_v10 }
  0x17   :  { %275 = vmatpush3.bf16.msra.mxu0 %v297_v13 }
  0x18   :  { %276 = vmatprep.subr.bf16.mxu0 %v298_v14 }
  0x1b   :  { %277 = vmatpush3.bf16.msra.mxu0 %v299_v15 }
  0x1c   :  { %278 = vmatprep.subr.bf16.mxu0 %v300_v16 }
  0x1f   :  { %279 = vmatpush3.bf16.msra.mxu0 %v301_v17 }
  0x22   :  { %187 = vmatmul.mubr.bf16.vlgmr.msra.gmra.mrb[0].mxu0 %v245_v18 }
  0xf5   :  { %v280_v19 = vpop.f32.mrb[0].mxu0 }
  0xf6   :  { %v281_v20 = vpop.f32.mrb[1].mxu0 }
  0xf7   :  { %v282_v21 = vadd.f32 %v281_v20, %v280_v19  ;;  %v283_v22 = vpop.f32.mrb[2].mxu0 }
  0xf8   :  { %v284_v23 = vpop.f32.mrb[3].mxu0 }
  0xf9   :  { %v195_v24 = vsel %vm194_vm0, %v282_v21, 0.0  ;;  %v203_v25 = vmul.f32 %v282_v21, %v282_v21 }
  0xfa   :  { %v196_v26 = vrot.slane %v195_v24, 4 }
  0xfb   :  { %v204_v27 = vsel %vm194_vm0, %v203_v25, 0.0 }
  0xfc   :  { %v197_v28 = vadd.f32 %v196_v26, %v195_v24  ;;  %v205_v29 = vrot.slane %v204_v27, 4 }
  0xfe   :  { %v198_v30 = vrot.slane %v197_v28, 2  ;;  %v206_v31 = vadd.f32 %v205_v29, %v204_v27 }
 0x100   :  { %v199_v32 = vadd.f32 %v198_v30, %v197_v28  ;;  %v207_v33 = vrot.slane %v206_v31, 2 }
 0x102   :  { %v200_v34 = vrot.slane %v199_v32, 1  ;;  %v208_v35 = vadd.f32 %v207_v33, %v206_v31 }
 0x104   :  { %v201_v36 = vadd.f32 %v200_v34, %v199_v32  ;;  %v209_v37 = vrot.slane %v208_v35, 1 }
 0x106   :  { %v202_v38 = vmul.f32 0.125, %v201_v36  ;;  %v210_v39 = vadd.f32 %v209_v37, %v208_v35 }
 0x108   :  { %v211_v40 = vmul.f32 0.125, %v210_v39  ;;  %v212_v41 = vmul.f32 %v202_v38, %v202_v38  ;;  %v219_v51 = vsub.f32 %v282_v21, %v202_v38 }
 0x10a   :  { %v213_v42 = vsub.f32 %v211_v40, %v212_v41 }
 0x10c   :  { %v214_v43 = vmax.f32 %v213_v42, 0.0 }
 0x10e   :  { %v216_v44 = vadd.f32 1e-05, %v214_v43 }
 0x110   :  { %304 = vrsqrt.f32 %v216_v44 }
 0x11a   :  { %v305_v49 = vpop.eup %304 }
 0x11b   :  { %v218_v50 = vmul.f32 %v305_v49, %v215_v47 }
 0x11d   :  { %v224_v52 = vrot.slane %v218_v50, %v223_v48 }
 0x11f   :  { %v226_v54 = vmul.f32 %v224_v52, %v219_v51 }
 0x121   :  { %v234_v55 = vadd.f32 %v263_v53, %v226_v54 }
 0x123   :  { %vm235_vm1 = vcmp.gt.f32.partialorder %v234_v55, 0.0  ;;  %v236_v56 = vmul.f32 0.2, %v234_v55 }
 0x125   :  { %v237_v57 = vsel %vm235_vm1, %v234_v55, %v236_v56 }
 0x126   :  { %v238_v58 = vpack.c.bf16 %v237_v57, %v237_v57 }
 0x128   :  { %240 = vst.msk [vmem:[%s395_s4] sm:$0xf] %vm239_vm2, %v238_v58 }

// kernel: discriminator_forward.7
= control target key start
LH: loop header
LB: loop body
LE: loop exit
PB: predicated region body
PF: predicated region fallthrough
CT: control target
= control target key end

     0   :  { %vm376_vm0 = vcmask 7168   ;;  %s627_s1 = inlined_call_operand.vmem [shape: bf16[512,1], index: 1, kind: input, shape index: {}]   ;;  %s628_s0 = inlined_call_operand.vmem [shape: bf16[8,512], index: 0, kind: input, shape index: {}]   ;;  %s629_s2 = inlined_call_operand.<no memory space> [shape: f32[1,1], index: 2, kind: input, shape index: {}]   ;;  %s630_s3 = inlined_call_operand.vmem [shape: f32[8,1], index: 3, kind: output, shape index: {}]  }
   0x1   :  { %v463_v0 = vld [vmem:[%s627_s1 + $0x40] sm:$0xff]   ;;  %v467_v4 = vld [vmem:[%s627_s1 + $0x48] sm:$0xff]   ;;  %v471_v8 = vld [vmem:[%s627_s1 + $0x50] sm:$0xff]   ;;  %v8_v38 = vstv %s629_s2 }
   0x2   :  { %v464_v1 = vld [vmem:[%s627_s1 + $0xc0] sm:$0xff]   ;;  %419 = vmatprep.subr.bf16.mxu0 %v463_v0  ;;  %v468_v5 = vld [vmem:[%s627_s1 + $0xc8] sm:$0xff]   ;;  %v472_v9 = vld [vmem:[%s627_s1 + $0xd0] sm:$0xff]   ;;  %9 = vst [vmem:[#allocation2] sm:$0x1] %v8_v38 }
   0x3   :  { %v465_v2 = vld [vmem:[%s627_s1] sm:$0xff]   ;;  %441 = vmatprep.subr.bf16.mxu1 %v464_v1  ;;  %v469_v6 = vld [vmem:[%s627_s1 + $0x8] sm:$0xff]   ;;  %v473_v10 = vld [vmem:[%s627_s1 + $0x10] sm:$0xff]  }
   0x4   :  { %v466_v3 = vld [vmem:[%s627_s1 + $0x80] sm:$0xff]   ;;  %420 = vmatpush3.bf16.msra.mxu0 %v465_v2  ;;  %v470_v7 = vld [vmem:[%s627_s1 + $0x88] sm:$0xff]   ;;  %v474_v11 = vld [vmem:[%s627_s1 + $0x90] sm:$0xff]  }
   0x5   :  { %442 = vmatpush3.bf16.msra.mxu1 %v466_v3  ;;  %421 = vmatprep.subr.bf16.mxu0 %v467_v4  ;;  %v475_v12 = vld [vmem:[%s627_s1 + $0x58] sm:$0xff]   ;;  %v479_v16 = vld [vmem:[%s627_s1 + $0x60] sm:$0xff]   ;;  %v483_v20 = vld [vmem:[%s627_s1 + $0x68] sm:$0xff]  }
   0x6   :  { %443 = vmatprep.subr.bf16.mxu1 %v468_v5  ;;  %v476_v13 = vld [vmem:[%s627_s1 + $0xd8] sm:$0xff]   ;;  %v480_v17 = vld [vmem:[%s627_s1 + $0xe0] sm:$0xff]   ;;  %v484_v21 = vld [vmem:[%s627_s1 + $0xe8] sm:$0xff]  }
   0x7   :  { %v477_v14 = vld [vmem:[%s627_s1 + $0x18] sm:$0xff]   ;;  %v481_v18 = vld [vmem:[%s627_s1 + $0x20] sm:$0xff]   ;;  %v485_v22 = vld [vmem:[%s627_s1 + $0x28] sm:$0xff]  }
   0x8   :  { %422 = vmatpush3.bf16.msra.mxu0 %v469_v6  ;;  %v478_v15 = vld [vmem:[%s627_s1 + $0x98] sm:$0xff]   ;;  %v482_v19 = vld [vmem:[%s627_s1 + $0xa0] sm:$0xff]   ;;  %v486_v23 = vld [vmem:[%s627_s1 + $0xa8] sm:$0xff]  }
   0x9   :  { %444 = vmatpush3.bf16.msra.mxu1 %v470_v7  ;;  %423 = vmatprep.subr.bf16.mxu0 %v471_v8  ;;  %v487_v24 = vld [vmem:[%s627_s1 + $0x70] sm:$0xff]   ;;  %v491_v28 = vld [vmem:[%s627_s1 + $0x78] sm:$0xff]   ;;  %v17_v32 = vld [vmem:[%s628_s0] sm:$0xff] }
   0xa   :  { %445 = vmatprep.subr.bf16.mxu1 %v472_v9  ;;  %v488_v25 = vld [vmem:[%s627_s1 + $0xf0] sm:$0xff]   ;;  %v492_v29 = vld [vmem:[%s627_s1 + $0xf8] sm:$0xff]   ;;  %v18_v33 = vld [vmem:[%s628_s0 + $0x8] sm:$0xff]  ;;  %v383_v34 = vcombine.low %v17_v32, %v17_v32  ;;  %v384_v35 = vcombine.high %v17_v32, %v17_v32 }
   0xb   :  { %v489_v26 = vld [vmem:[%s627_s1 + $0x30] sm:$0xff]   ;;  %v493_v30 = vld [vmem:[%s627_s1 + $0x38] sm:$0xff]   ;;  %v385_v36 = vcombine.low %v18_v33, %v18_v33  ;;  %v386_v37 = vcombine.high %v18_v33, %v18_v33  ;;  %v382_v41 = vld [vmem:[#allocation2] ss:$0 sm:$0xff] }
   0xc   :  { %424 = vmatpush3.bf16.msra.mxu0 %v473_v10  ;;  %v490_v27 = vld [vmem:[%s627_s1 + $0xb0] sm:$0xff]   ;;  %v494_v31 = vld [vmem:[%s627_s1 + $0xb8] sm:$0xff]   ;;  %328 = vmatprep.mubr.bf16.mxu0 %v384_v35 }
   0xd   :  { %446 = vmatpush3.bf16.msra.mxu1 %v474_v11  ;;  %425 = vmatprep.subr.bf16.mxu0 %v475_v12 }
   0xe   :  { %447 = vmatprep.subr.bf16.mxu1 %v476_v13  ;;  %368 = vmatprep.mubr.bf16.mxu1 %v386_v37 }
  0x10   :  { %426 = vmatpush3.bf16.msra.mxu0 %v477_v14 }
  0x11   :  { %448 = vmatpush3.bf16.msra.mxu1 %v478_v15  ;;  %427 = vmatprep.subr.bf16.mxu0 %v479_v16 }
  0x12   :  { %449 = vmatprep.subr.bf16.mxu1 %v480_v17 }
  0x14   :  { %428 = vmatpush3.bf16.msra.mxu0 %v481_v18 }
  0x15   :  { %450 = vmatpush3.bf16.msra.mxu1 %v482_v19  ;;  %429 = vmatprep.subr.bf16.mxu0 %v483_v20 }
  0x16   :  { %451 = vmatprep.subr.bf16.mxu1 %v484_v21 }
  0x18   :  { %430 = vmatpush3.bf16.msra.mxu0 %v485_v22 }
  0x19   :  { %452 = vmatpush3.bf16.msra.mxu1 %v486_v23  ;;  %431 = vmatprep.subr.bf16.mxu0 %v487_v24 }
  0x1a   :  { %453 = vmatprep.subr.bf16.mxu1 %v488_v25 }
  0x1c   :  { %432 = vmatpush3.bf16.msra.mxu0 %v489_v26 }
  0x1d   :  { %454 = vmatpush3.bf16.msra.mxu1 %v490_v27  ;;  %433 = vmatprep.subr.bf16.mxu0 %v491_v28 }
  0x1e   :  { %455 = vmatprep.subr.bf16.mxu1 %v492_v29 }
  0x20   :  { %434 = vmatpush3.bf16.msra.mxu0 %v493_v30 }
  0x21   :  { %456 = vmatpush3.bf16.msra.mxu1 %v494_v31 }
  0x23   :  { %329 = vmatmul.mubr.bf16.vlgmr.msra.gmra.mrb[0].mxu0 %v383_v34 }
  0x24   :  { %369 = vmatmul.mubr.bf16.vlgmr.msra.gmra.mrb[0].mxu1 %v385_v36 }
  0xf6   :  { %v435_v39 = vpop.f32.mrb[0].mxu0 }
  0xf7   :  { %v457_v40 = vpop.f32.mrb[0].mxu1  ;;  %v436_v42 = vpop.f32.mrb[1].mxu0 }
  0xf8   :  { %v458_v43 = vpop.f32.mrb[1].mxu1  ;;  %v437_v44 = vadd.f32 %v436_v42, %v435_v39  ;;  %v438_v46 = vpop.f32.mrb[2].mxu0 }
  0xf9   :  { %v459_v45 = vadd.f32 %v458_v43, %v457_v40  ;;  %v460_v47 = vpop.f32.mrb[2].mxu1  ;;  %v439_v48 = vpop.f32.mrb[3].mxu0 }
  0xfa   :  { %v461_v49 = vpop.f32.mrb[3].mxu1  ;;  %v331_v50 = vadd.f32 %v437_v44, %v382_v41 }
  0xfc   :  { %v371_v51 = vadd.f32 %v459_v45, %v331_v50 }
  0xfe   :  { %377 = vst.msk [vmem:[%s630_s3] sm:$0xff] %vm376_vm0, %v371_v51 }

</bundles_post_ra>
